<compile_context>
chip_gen: v7x
topology: tpu7x:2x2x1
jax: 0.10.0
libtpu: 0.0.40
codegen_flags: <defaults>
</compile_context>

<pallas_src>
import functools

import jax
import jax.numpy as jnp
from jax.experimental import pallas as pl
from jax.experimental.pallas import tpu as pltpu

LOG_STD_MIN = -20.0
LOG_STD_MAX = 2.0


def _round_up(n, m):
    return ((n + m - 1) // m) * m


def policy_kernel(x_ref,
                  w1_ref, b1_ref, w2_ref, b2_ref,
                  w3_ref, b3_ref, w4_ref, b4_ref,
                  wh_ref, bh_ref,
                  out_ref, *, num_actions):
    """One batch tile of the actor MLP.

    Matmul operands are cast to the weight dtype (bf16 by default) for native
    MXU rate; accumulation and the bias/tanh/clip epilogue stay in f32.  The
    two output heads are fused: columns [0, A) of the output slab hold
    tanh(mean), columns [A, 2A) hold clamped log_std, the rest is zero padding
    (sliced off in the wrapper)."""

    def layer(a, w_ref, b_ref):
        y = jnp.dot(a.astype(w_ref.dtype), w_ref[...],
                    preferred_element_type=jnp.float32)
        return y + b_ref[...]          # bias-add in f32

    h = jnp.maximum(layer(x_ref[...], w1_ref, b1_ref), 0.0)
    h = jnp.maximum(layer(h, w2_ref, b2_ref), 0.0)
    h = jnp.maximum(layer(h, w3_ref, b3_ref), 0.0)
    h = jnp.maximum(layer(h, w4_ref, b4_ref), 0.0)

    # Single fused head matmul -> lane-dense [tb, head_pad] slab (f32).
    head = layer(h, wh_ref, bh_ref)

    col = jax.lax.broadcasted_iota(jnp.int32, head.shape, 1)
    out_ref[...] = jnp.where(
        col < num_actions,
        jnp.tanh(head),                              # mean half
        jnp.clip(head, LOG_STD_MIN, LOG_STD_MAX),    # log_std half (+ padding)
    ).astype(out_ref.dtype)


def prepare_params(params, compute_dtype=jnp.bfloat16):
    """One-time parameter preparation (hoisted out of the jitted forward):

      * fuse the mean / log_std heads into a single lane-dense, 128-padded
        weight so the kernel issues one unmasked store per tile,
      * zero-pad the hidden dimension to a multiple of 128 (exact, see above),
      * cast matmul weights to `compute_dtype` (bf16 by default); biases stay
        f32 because the epilogue runs in f32.
    """
    num_inputs, hidden = params["w1"].shape
    num_actions = params["wm"].shape[1]
    hidden_pad = _round_up(hidden, 128)
    head_pad = max(128, _round_up(2 * num_actions, 128))

    def pad_w(w, rows, cols):
        z = jnp.zeros((rows, cols), jnp.float32)
        return z.at[:w.shape[0], :w.shape[1]].set(w)

    def pad_b(b, cols):
        z = jnp.zeros((1, cols), jnp.float32)
        return z.at[:, :b.shape[1]].set(b)

    wh = jnp.zeros((hidden_pad, head_pad), jnp.float32)
    wh = wh.at[:hidden, :num_actions].set(params["wm"])
    wh = wh.at[:hidden, num_actions:2 * num_actions].set(params["ws"])
    bh = jnp.zeros((1, head_pad), jnp.float32)
    bh = bh.at[:, :num_actions].set(params["bm"])
    bh = bh.at[:, num_actions:2 * num_actions].set(params["bs"])

    return dict(
        w1=pad_w(params["w1"], num_inputs, hidden_pad).astype(compute_dtype),
        b1=pad_b(params["b1"], hidden_pad),
        w2=pad_w(params["w2"], hidden_pad, hidden_pad).astype(compute_dtype),
        b2=pad_b(params["b2"], hidden_pad),
        w3=pad_w(params["w3"], hidden_pad, hidden_pad).astype(compute_dtype),
        b3=pad_b(params["b3"], hidden_pad),
        w4=pad_w(params["w4"], hidden_pad, hidden_pad).astype(compute_dtype),
        b4=pad_b(params["b4"], hidden_pad),
        wh=wh.astype(compute_dtype),
        bh=bh,
    )


@functools.partial(jax.jit, static_argnames=("num_actions", "tb", "out_dtype"))
def policy_forward(x, prepared, *, num_actions, tb=512, out_dtype=jnp.float32):
    """x: [B, num_inputs] float32.  prepared: output of prepare_params.

    Returns (mean, log_std), each [B, num_actions] float32."""
    B, num_inputs = x.shape
    hidden_pad = prepared["w1"].shape[1]
    head_pad = prepared["wh"].shape[1]

    # ---- Batch tiling ------------------------------------------------------
    # Big tile for MXU utilization, but never fewer than 2 grid steps when the
    # batch allows it, so dimension_semantics=("parallel",) has something to
    # shard across the two TensorCores on v7x.
    half = _round_up(max(1, (B + 1) // 2), 8)
    tb_eff = max(8, min(tb, half))

    weight_args = [prepared["w1"], prepared["b1"],
                   prepared["w2"], prepared["b2"],
                   prepared["w3"], prepared["b3"],
                   prepared["w4"], prepared["b4"],
                   prepared["wh"], prepared["bh"]]

    # ---- VMEM budget -------------------------------------------------------
    weight_bytes = sum(a.size * a.dtype.itemsize for a in weight_args)
    out_itemsize = jnp.dtype(out_dtype).itemsize

    def vmem_estimate(tbe):
        x_tile = tbe * num_inputs * 4
        out_tile = tbe * head_pad * out_itemsize
        act_tile = tbe * hidden_pad * 4
        # weights x2 buffers (pipeline default), x/out tiles x2, ~6 activation
        # temps (f32 h + bf16 copies per layer, conservatively).
        return 2 * weight_bytes + 2 * (x_tile + out_tile) + 6 * act_tile

    # Shrink the batch tile if a large hidden size would blow the scoped VMEM.
    while tb_eff > 64 and vmem_estimate(tb_eff) > (40 << 20):
        tb_eff = max(64, _round_up(tb_eff // 2, 8))

    grid = (pl.cdiv(B, tb_eff),)   # ragged tail handled by Pallas (masked)

    vmem_limit = int(1.25 * vmem_estimate(tb_eff))
    vmem_limit = max(vmem_limit, 4 << 20)
    vmem_limit = min(vmem_limit, 64 << 20)

    def x_map(i):
        return (i, 0)

    def const_map(i):
        return (0, 0)

    # Grid-invariant blocks (constant index_map): Mosaic does not re-DMA a
    # block whose index does not change across grid steps.
    weight_specs = [pl.BlockSpec(a.shape, const_map) for a in weight_args]

    out = pl.pallas_call(
        functools.partial(policy_kernel, num_actions=num_actions),
        out_shape=jax.ShapeDtypeStruct((B, head_pad), out_dtype),
        grid_spec=pltpu.PrefetchScalarGridSpec(
            num_scalar_prefetch=0,
            grid=grid,
            in_specs=[pl.BlockSpec((tb_eff, num_inputs), x_map)] + weight_specs,
            out_specs=pl.BlockSpec((tb_eff, head_pad), x_map),
        ),
        compiler_params=pltpu.CompilerParams(
            dimension_semantics=("parallel",),
            vmem_limit_bytes=vmem_limit),
    )(x, *weight_args)

    mean = out[:, :num_actions].astype(jnp.float32)
    log_std = out[:, num_actions:2 * num_actions].astype(jnp.float32)
    return mean, log_std


def init_params(key, num_inputs, num_actions, hidden_size, init_w=0.003):
    """Deterministic init mirroring PyTorch shapes (weights stored transposed
    as [in, out]; biases as [1, out] for in-kernel broadcasting)."""
    keys = jax.random.split(key, 12)

    def linear(kw, kb, fan_in, fan_out, bound):
        w = jax.random.uniform(kw, (fan_in, fan_out), jnp.float32, -bound, bound)
        b = jax.random.uniform(kb, (1, fan_out), jnp.float32, -bound, bound)
        return w, b

    # hidden layers use PyTorch's default Linear init bound 1/sqrt(fan_in)
    w1, b1 = linear(keys[0], keys[1], num_inputs, hidden_size, 1.0 / num_inputs ** 0.5)
    w2, b2 = linear(keys[2], keys[3], hidden_size, hidden_size, 1.0 / hidden_size ** 0.5)
    w3, b3 = linear(keys[4], keys[5], hidden_size, hidden_size, 1.0 / hidden_size ** 0.5)
    w4, b4 = linear(keys[6], keys[7], hidden_size, hidden_size, 1.0 / hidden_size ** 0.5)
    # output heads use uniform(-init_w, init_w) as in the module __init__
    wm, bm = linear(keys[8], keys[9], hidden_size, num_actions, init_w)
    ws, bs = linear(keys[10], keys[11], hidden_size, num_actions, init_w)

    return dict(w1=w1, b1=b1, w2=w2, b2=b2, w3=w3, b3=b3, w4=w4, b4=b4,
                wm=wm, bm=bm, ws=ws, bs=bs)


def reference_forward(x, p):
    h = jax.nn.relu(x @ p["w1"] + p["b1"])
    h = jax.nn.relu(h @ p["w2"] + p["b2"])
    h = jax.nn.relu(h @ p["w3"] + p["b3"])
    h = jax.nn.relu(h @ p["w4"] + p["b4"])
    mean = jnp.tanh(h @ p["wm"] + p["bm"])
    log_std = jnp.clip(h @ p["ws"] + p["bs"], LOG_STD_MIN, LOG_STD_MAX)
    return mean, log_std


if __name__ == "__main__":
    num_inputs, num_actions, hidden_size = 16, 4, 32
    batch = 10  # intentionally not a multiple of 8 to exercise the ragged path

    key = jax.random.PRNGKey(0)
    kx, kp = jax.random.split(key)
    params = init_params(kp, num_inputs, num_actions, hidden_size)
    x = jax.random.normal(kx, (batch, num_inputs), jnp.float32)

    prepared = prepare_params(params)                 # one-time prep (bf16 weights)
    mean, log_std = policy_forward(x, prepared, num_actions=num_actions)
    jax.block_until_ready((mean, log_std))

    ref_mean, ref_log_std = reference_forward(x, params)
    assert mean.shape == (batch, num_actions)
    assert log_std.shape == (batch, num_actions)
    # bf16 matmul operands -> tolerance relaxed vs. the pure-f32 reference.
    assert jnp.allclose(mean, ref_mean, atol=2e-2, rtol=2e-2)
    assert jnp.allclose(log_std, ref_log_std, atol=2e-2, rtol=2e-2)

    print("KERNEL_OK")
</pallas_src>

<mosaic_0001>
module attributes {stable_mosaic.version = 11 : i64} {
  func.func @policy_kernel(%arg0: i32, %arg1: memref<8x16xf32, #tpu.memory_space<vmem>>, %arg2: memref<16x128xbf16, #tpu.memory_space<vmem>>, %arg3: memref<1x128xf32, #tpu.memory_space<vmem>>, %arg4: memref<128x128xbf16, #tpu.memory_space<vmem>>, %arg5: memref<1x128xf32, #tpu.memory_space<vmem>>, %arg6: memref<128x128xbf16, #tpu.memory_space<vmem>>, %arg7: memref<1x128xf32, #tpu.memory_space<vmem>>, %arg8: memref<128x128xbf16, #tpu.memory_space<vmem>>, %arg9: memref<1x128xf32, #tpu.memory_space<vmem>>, %arg10: memref<128x128xbf16, #tpu.memory_space<vmem>>, %arg11: memref<1x128xf32, #tpu.memory_space<vmem>>, %arg12: memref<8x128xf32, #tpu.memory_space<vmem>>) attributes {dimension_semantics = [#tpu.dimension_semantics<parallel>], iteration_bounds = array<i64: 2>, scalar_prefetch = 0 : i64, scratch_operands = 0 : i64, tpu.core_type = #tpu.core_type<tc>, window_params = [{transform_indices = @transform_0, window_bounds = array<i64: 8, 16>}, {pipeline_mode = #tpu.pipeline_mode<synchronous>, transform_indices = @transform_1, window_bounds = array<i64: 16, 128>}, {pipeline_mode = #tpu.pipeline_mode<synchronous>, transform_indices = @transform_2, window_bounds = array<i64: 1, 128>}, {pipeline_mode = #tpu.pipeline_mode<synchronous>, transform_indices = @transform_3, window_bounds = array<i64: 128, 128>}, {pipeline_mode = #tpu.pipeline_mode<synchronous>, transform_indices = @transform_4, window_bounds = array<i64: 1, 128>}, {pipeline_mode = #tpu.pipeline_mode<synchronous>, transform_indices = @transform_5, window_bounds = array<i64: 128, 128>}, {pipeline_mode = #tpu.pipeline_mode<synchronous>, transform_indices = @transform_6, window_bounds = array<i64: 1, 128>}, {pipeline_mode = #tpu.pipeline_mode<synchronous>, transform_indices = @transform_7, window_bounds = array<i64: 128, 128>}, {pipeline_mode = #tpu.pipeline_mode<synchronous>, transform_indices = @transform_8, window_bounds = array<i64: 1, 128>}, {pipeline_mode = #tpu.pipeline_mode<synchronous>, transform_indices = @transform_9, window_bounds = array<i64: 128, 128>}, {pipeline_mode = #tpu.pipeline_mode<synchronous>, transform_indices = @transform_10, window_bounds = array<i64: 1, 128>}, {transform_indices = @transform_11, window_bounds = array<i64: 8, 128>}]} {
    %c0 = arith.constant 0 : index
    %c0_0 = arith.constant 0 : index
    %0 = vector.load %arg1[%c0, %c0_0] : memref<8x16xf32, #tpu.memory_space<vmem>>, vector<8x16xf32>
    %1 = arith.truncf %0 : vector<8x16xf32> to vector<8x16xbf16>
    %c0_1 = arith.constant 0 : index
    %c0_2 = arith.constant 0 : index
    %2 = vector.load %arg2[%c0_1, %c0_2] : memref<16x128xbf16, #tpu.memory_space<vmem>>, vector<16x128xbf16>
    %cst = arith.constant dense<0.000000e+00> : vector<8x128xf32>
    %3 = tpu.matmul %1, %2, %cst {dimension_numbers = #tpu.dot_dimension_numbers<[1], [0], [0], [1], [0, 0, 1, 1], [], []>} : vector<8x16xbf16>, vector<16x128xbf16>, vector<8x128xf32> -> vector<8x128xf32>
    %c0_3 = arith.constant 0 : index
    %c0_4 = arith.constant 0 : index
    %4 = vector.load %arg3[%c0_3, %c0_4] : memref<1x128xf32, #tpu.memory_space<vmem>>, vector<1x128xf32>
    %5 = vector.broadcast %4 : vector<1x128xf32> to vector<8x128xf32>
    %6 = arith.addf %3, %5 : vector<8x128xf32>
    %cst_5 = arith.constant 0.000000e+00 : f32
    %7 = vector.broadcast %cst_5 : f32 to vector<8x128xf32>
    %8 = arith.maximumf %6, %7 : vector<8x128xf32>
    %9 = arith.truncf %8 : vector<8x128xf32> to vector<8x128xbf16>
    %c0_6 = arith.constant 0 : index
    %c0_7 = arith.constant 0 : index
    %10 = vector.load %arg4[%c0_6, %c0_7] : memref<128x128xbf16, #tpu.memory_space<vmem>>, vector<128x128xbf16>
    %cst_8 = arith.constant dense<0.000000e+00> : vector<8x128xf32>
    %11 = tpu.matmul %9, %10, %cst_8 {dimension_numbers = #tpu.dot_dimension_numbers<[1], [0], [0], [1], [0, 0, 1, 1], [], []>} : vector<8x128xbf16>, vector<128x128xbf16>, vector<8x128xf32> -> vector<8x128xf32>
    %c0_9 = arith.constant 0 : index
    %c0_10 = arith.constant 0 : index
    %12 = vector.load %arg5[%c0_9, %c0_10] : memref<1x128xf32, #tpu.memory_space<vmem>>, vector<1x128xf32>
    %13 = vector.broadcast %12 : vector<1x128xf32> to vector<8x128xf32>
    %14 = arith.addf %11, %13 : vector<8x128xf32>
    %cst_11 = arith.constant 0.000000e+00 : f32
    %15 = vector.broadcast %cst_11 : f32 to vector<8x128xf32>
    %16 = arith.maximumf %14, %15 : vector<8x128xf32>
    %17 = arith.truncf %16 : vector<8x128xf32> to vector<8x128xbf16>
    %c0_12 = arith.constant 0 : index
    %c0_13 = arith.constant 0 : index
    %18 = vector.load %arg6[%c0_12, %c0_13] : memref<128x128xbf16, #tpu.memory_space<vmem>>, vector<128x128xbf16>
    %cst_14 = arith.constant dense<0.000000e+00> : vector<8x128xf32>
    %19 = tpu.matmul %17, %18, %cst_14 {dimension_numbers = #tpu.dot_dimension_numbers<[1], [0], [0], [1], [0, 0, 1, 1], [], []>} : vector<8x128xbf16>, vector<128x128xbf16>, vector<8x128xf32> -> vector<8x128xf32>
    %c0_15 = arith.constant 0 : index
    %c0_16 = arith.constant 0 : index
    %20 = vector.load %arg7[%c0_15, %c0_16] : memref<1x128xf32, #tpu.memory_space<vmem>>, vector<1x128xf32>
    %21 = vector.broadcast %20 : vector<1x128xf32> to vector<8x128xf32>
    %22 = arith.addf %19, %21 : vector<8x128xf32>
    %cst_17 = arith.constant 0.000000e+00 : f32
    %23 = vector.broadcast %cst_17 : f32 to vector<8x128xf32>
    %24 = arith.maximumf %22, %23 : vector<8x128xf32>
    %25 = arith.truncf %24 : vector<8x128xf32> to vector<8x128xbf16>
    %c0_18 = arith.constant 0 : index
    %c0_19 = arith.constant 0 : index
    %26 = vector.load %arg8[%c0_18, %c0_19] : memref<128x128xbf16, #tpu.memory_space<vmem>>, vector<128x128xbf16>
    %cst_20 = arith.constant dense<0.000000e+00> : vector<8x128xf32>
    %27 = tpu.matmul %25, %26, %cst_20 {dimension_numbers = #tpu.dot_dimension_numbers<[1], [0], [0], [1], [0, 0, 1, 1], [], []>} : vector<8x128xbf16>, vector<128x128xbf16>, vector<8x128xf32> -> vector<8x128xf32>
    %c0_21 = arith.constant 0 : index
    %c0_22 = arith.constant 0 : index
    %28 = vector.load %arg9[%c0_21, %c0_22] : memref<1x128xf32, #tpu.memory_space<vmem>>, vector<1x128xf32>
    %29 = vector.broadcast %28 : vector<1x128xf32> to vector<8x128xf32>
    %30 = arith.addf %27, %29 : vector<8x128xf32>
    %cst_23 = arith.constant 0.000000e+00 : f32
    %31 = vector.broadcast %cst_23 : f32 to vector<8x128xf32>
    %32 = arith.maximumf %30, %31 : vector<8x128xf32>
    %33 = arith.truncf %32 : vector<8x128xf32> to vector<8x128xbf16>
    %c0_24 = arith.constant 0 : index
    %c0_25 = arith.constant 0 : index
    %34 = vector.load %arg10[%c0_24, %c0_25] : memref<128x128xbf16, #tpu.memory_space<vmem>>, vector<128x128xbf16>
    %cst_26 = arith.constant dense<0.000000e+00> : vector<8x128xf32>
    %35 = tpu.matmul %33, %34, %cst_26 {dimension_numbers = #tpu.dot_dimension_numbers<[1], [0], [0], [1], [0, 0, 1, 1], [], []>} : vector<8x128xbf16>, vector<128x128xbf16>, vector<8x128xf32> -> vector<8x128xf32>
    %c0_27 = arith.constant 0 : index
    %c0_28 = arith.constant 0 : index
    %36 = vector.load %arg11[%c0_27, %c0_28] : memref<1x128xf32, #tpu.memory_space<vmem>>, vector<1x128xf32>
    %37 = vector.broadcast %36 : vector<1x128xf32> to vector<8x128xf32>
    %38 = arith.addf %35, %37 : vector<8x128xf32>
    %39 = tpu.iota {dimensions = array<i32: 1>} : vector<8x128xi32>
    %c4_i32 = arith.constant 4 : i32
    %40 = vector.broadcast %c4_i32 : i32 to vector<8x128xi32>
    %41 = arith.cmpi slt, %39, %40 : vector<8x128xi32>
    %42 = math.tanh %38 : vector<8x128xf32>
    %cst_29 = arith.constant -2.000000e+01 : f32
    %cst_30 = arith.constant 2.000000e+00 : f32
    %43 = vector.broadcast %cst_29 : f32 to vector<8x128xf32>
    %44 = arith.maximumf %43, %38 : vector<8x128xf32>
    %45 = vector.broadcast %cst_30 : f32 to vector<8x128xf32>
    %46 = arith.minimumf %45, %44 : vector<8x128xf32>
    %47 = arith.select %41, %42, %46 : vector<8x128xi1>, vector<8x128xf32>
    %c0_31 = arith.constant 0 : index
    %c0_32 = arith.constant 0 : index
    %48 = vector.load %arg12[%c0_31, %c0_32] : memref<8x128xf32, #tpu.memory_space<vmem>>, vector<8x128xf32>
    tpu.vector_store %arg12[%c0_31, %c0_32], %47 {strides = array<i32>} : memref<8x128xf32, #tpu.memory_space<vmem>>, vector<8x128xf32>,
    return
  }
  func.func @transform_0(%arg0: i32) -> (i32, i32) {
    %c0_i32 = arith.constant 0 : i32
    %c0_i32_0 = arith.constant 0 : i32
    return %arg0, %c0_i32 : i32, i32
  }
  func.func @transform_1(%arg0: i32) -> (i32, i32) {
    %c0_i32 = arith.constant 0 : i32
    %c0_i32_0 = arith.constant 0 : i32
    %c0_i32_1 = arith.constant 0 : i32
    return %c0_i32, %c0_i32_0 : i32, i32
  }
  func.func @transform_2(%arg0: i32) -> (i32, i32) {
    %c0_i32 = arith.constant 0 : i32
    %c0_i32_0 = arith.constant 0 : i32
    %c0_i32_1 = arith.constant 0 : i32
    return %c0_i32, %c0_i32_0 : i32, i32
  }
  func.func @transform_3(%arg0: i32) -> (i32, i32) {
    %c0_i32 = arith.constant 0 : i32
    %c0_i32_0 = arith.constant 0 : i32
    %c0_i32_1 = arith.constant 0 : i32
    return %c0_i32, %c0_i32_0 : i32, i32
  }
  func.func @transform_4(%arg0: i32) -> (i32, i32) {
    %c0_i32 = arith.constant 0 : i32
    %c0_i32_0 = arith.constant 0 : i32
    %c0_i32_1 = arith.constant 0 : i32
    return %c0_i32, %c0_i32_0 : i32, i32
  }
  func.func @transform_5(%arg0: i32) -> (i32, i32) {
    %c0_i32 = arith.constant 0 : i32
    %c0_i32_0 = arith.constant 0 : i32
    %c0_i32_1 = arith.constant 0 : i32
    return %c0_i32, %c0_i32_0 : i32, i32
  }
  func.func @transform_6(%arg0: i32) -> (i32, i32) {
    %c0_i32 = arith.constant 0 : i32
    %c0_i32_0 = arith.constant 0 : i32
    %c0_i32_1 = arith.constant 0 : i32
    return %c0_i32, %c0_i32_0 : i32, i32
  }
  func.func @transform_7(%arg0: i32) -> (i32, i32) {
    %c0_i32 = arith.constant 0 : i32
    %c0_i32_0 = arith.constant 0 : i32
    %c0_i32_1 = arith.constant 0 : i32
    return %c0_i32, %c0_i32_0 : i32, i32
  }
  func.func @transform_8(%arg0: i32) -> (i32, i32) {
    %c0_i32 = arith.constant 0 : i32
    %c0_i32_0 = arith.constant 0 : i32
    %c0_i32_1 = arith.constant 0 : i32
    return %c0_i32, %c0_i32_0 : i32, i32
  }
  func.func @transform_9(%arg0: i32) -> (i32, i32) {
    %c0_i32 = arith.constant 0 : i32
    %c0_i32_0 = arith.constant 0 : i32
    %c0_i32_1 = arith.constant 0 : i32
    return %c0_i32, %c0_i32_0 : i32, i32
  }
  func.func @transform_10(%arg0: i32) -> (i32, i32) {
    %c0_i32 = arith.constant 0 : i32
    %c0_i32_0 = arith.constant 0 : i32
    %c0_i32_1 = arith.constant 0 : i32
    return %c0_i32, %c0_i32_0 : i32, i32
  }
  func.func @transform_11(%arg0: i32) -> (i32, i32) {
    %c0_i32 = arith.constant 0 : i32
    %c0_i32_0 = arith.constant 0 : i32
    return %arg0, %c0_i32 : i32, i32
  }
}

</mosaic_0001>

<bundles_post_ra>
// kernel: policy_forward.1
= control target key start
LH: loop header
LB: loop body
LE: loop exit
PB: predicated region body
PF: predicated region fallthrough
CT: control target
= control target key end

     0   :  { %s1942_s0 = inlined_call_operand.hbm [shape: f32[10,16], index: 0, kind: input, shape index: {}]   ;;  %s1943_s1 = inlined_call_operand.vmem [shape: bf16[16,128], index: 1, kind: input, shape index: {}]   ;;  %s1944_s2 = inlined_call_operand.vmem [shape: f32[1,128], index: 2, kind: input, shape index: {}]   ;;  %s1945_s3 = inlined_call_operand.hbm [shape: bf16[128,128], index: 3, kind: input, shape index: {}]   ;;  %s1946_s4 = inlined_call_operand.vmem [shape: f32[1,128], index: 4, kind: input, shape index: {}]   ;;  %s1947_s5 = inlined_call_operand.hbm [shape: bf16[128,128], index: 5, kind: input, shape index: {}]   ;;  %s1948_s6 = inlined_call_operand.vmem [shape: f32[1,128], index: 6, kind: input, shape index: {}]   ;;  %s1949_s7 = inlined_call_operand.hbm [shape: bf16[128,128], index: 7, kind: input, shape index: {}]   ;;  %s1950_s8 = inlined_call_operand.vmem [shape: f32[1,128], index: 8, kind: input, shape index: {}]   ;;  %s1951_s9 = inlined_call_operand.hbm [shape: bf16[128,128], index: 9, kind: input, shape index: {}]   ;;  %s1952_s10 = inlined_call_operand.vmem [shape: f32[1,128], index: 10, kind: input, shape index: {}]   ;;  %s1953_s11 = inlined_call_operand.vmem [shape: f32[10,128], index: 11, kind: output, shape index: {}]  }
   0x1   :  { %1956 = sst [smem:[#allocation13_spill]] %s1950_s8 }
   0x2   :  { %1957 = sst [smem:[#allocation14_spill]] %s1952_s10 }
   0x3   :  { %1958 = sst [smem:[#allocation15_spill]] %s1953_s11 }
   0x4   :  { %16 = vsyncpa [#allocation3], 0 }
   0x5   :  { %18 = vsyncpa [#allocation3 + $0x1], 0 }
   0x6   :  { %19 = vsyncpa [#allocation5], 0 }
   0x7   :  { %20 = vsyncpa [#allocation8], 0  ;;  %s1640_s17 = smov 0   ;;  %s1642_s18 = smov 0  }
   0x8   :  { %s1644_s19 = smov 0   ;;  %s1646_s20 = smov 0  }
   0x9 LB: > { %s1571_s21 = smov [#allocation4]   ;;  %s1661_s23 = sadd.s32 4294967295, %s1569_s20   ;;  %s1569_s20 = sphi %s1646_s20, %s1976_s20   ;;  %s1565_s19 = sphi %s1644_s19, %s1975_s19   ;;  %s1561_s18 = sphi %s1642_s18, %s1974_s18   ;;  %s1557_s17 = sphi %s1640_s17, %s1973_s17  }
   0xa   : > { %s311_s22 = sshll.u32 %s1571_s21, 4  ;;  %p1086_p0 = scmp.ge.s32.totalorder %s1569_s20, 1  ;;  %s1666_s22 = int_to_ptr.vmem [resolvable:$true] %s311_s22 }
   0xb   : > { %p1954_p1 = scmp.eq.s32.totalorder %s1661_s23, 0  ;;  %p293_p2 = scmp.lt.s32.totalorder %s1569_s20, 3 }
   0xc   : > { %s1572_s25 = smov [#allocation7]   ;;  %s1573_s28 = smov [#allocation6]  }
   0xd   : > { %p1668_p3 = pnand %p1086_p0, %p293_p2  ;;  %s343_s26 = sshll.u32 %s1572_s25, 4  ;;  %s1680_s26 = int_to_ptr.vmem [resolvable:$true] %s343_s26 }
   0xe   : > { %s327_s29 = sshll.u32 %s1573_s28, 4  ;;  %s1385_s13 = scalar_lea.hbm %s1945_s3, 1024  ;;  %s1682_s29 = int_to_ptr.vmem [resolvable:$true] %s327_s29 }
   0xf   : > { %s1959_s24 = scalar_select %p1668_p3, 1, 0 }
  0x10   : > { %p1284_p4 = pneg %p1668_p3  ;;  %p1386_p6 = scmp.ne.s32.totalorder %s1945_s3, %s1385_s13 }
  0x11   : > { %p1392_p10 = scmp.lt.u32.totalorder %s1385_s13, %s1945_s3 }
  0x12   : > { %p1676_p5 = pnand %p1284_p4, %p1954_p1 }
  0x14   : > { %p1692_p7 = pneg %p1676_p5 }
  0x16   : > { %p1388_p8 = pnand %p1692_p7, %p1386_p6 }
  0x18   : > { %p1389_p9 = pneg %p1388_p8 }
  0x1a   : > { %p1394_p11 = pnand %p1392_p10, %p1389_p9 }
  0x1c   : > { %1397 = shalt.err (!%p1394_p11)
}
  0x1d   : > { %s1398_s28 = scalar_lea.vmem %s1666_s22, 1024  ;;  %p1406_p2 = scmp.lt.s32.totalorder %s1666_s22, %s1666_s22 }
  0x1e   : > { %p1399_p12 = scmp.ne.s32.totalorder %s1666_s22, %s1398_s28  ;;  %p1407_p4 = scmp.lt.s32.totalorder %s1398_s28, %s1398_s28 }
  0x20   : > { %p1401_p13 = pnand %p1399_p12, %p1692_p7  ;;  %p1408_p6 = por %p1407_p4, %p1406_p2 }
  0x22   : > { %p1402_p0 = pneg %p1401_p13 }
  0x24   : > { %p1409_p8 = pnand %p1408_p6, %p1402_p0 }
  0x26   : > { %1412 = shalt.err (!%p1409_p8)
}
  0x27   : > { %s1574_s30 = smov 64   ;;  %s1575_s12 = smov 4  }
  0x28   : > { %1287 = dma.hbm_to_vmem [thread:$0]  (!%p1676_p5), %s1945_s3, 1024, %s1666_s22, [#allocation5], %s1574_s30, %s1574_s30, %s1575_s12  }
  0x29   : > { %s1413_s25 = scalar_lea.hbm %s1949_s7, 1024 }
  0x2a   : > { %p1414_p9 = scmp.ne.s32.totalorder %s1949_s7, %s1413_s25  ;;  %p1420_p12 = scmp.lt.u32.totalorder %s1413_s25, %s1949_s7 }
  0x2c   : > { %p1416_p10 = pnand %p1414_p9, %p1692_p7 }
  0x2e   : > { %p1417_p11 = pneg %p1416_p10 }
  0x30   : > { %p1422_p13 = pnand %p1420_p12, %p1417_p11 }
  0x32   : > { %1425 = shalt.err (!%p1422_p13)
}
  0x33   : > { %s1426_s22 = scalar_lea.vmem %s1680_s26, 1024  ;;  %p1434_p6 = scmp.lt.s32.totalorder %s1680_s26, %s1680_s26 }
  0x34   : > { %p1427_p0 = scmp.ne.s32.totalorder %s1680_s26, %s1426_s22  ;;  %p1435_p8 = scmp.lt.s32.totalorder %s1426_s22, %s1426_s22 }
  0x36   : > { %p1429_p2 = pnand %p1427_p0, %p1692_p7  ;;  %p1436_p9 = por %p1435_p8, %p1434_p6 }
  0x38   : > { %p1430_p4 = pneg %p1429_p2 }
  0x3a   : > { %p1437_p10 = pnand %p1436_p9, %p1430_p4 }
  0x3c   : > { %1440 = shalt.err (!%p1437_p10)
}
  0x3d   : > { %1293 = dma.hbm_to_vmem [thread:$0]  (!%p1676_p5), %s1949_s7, 1024, %s1680_s26, [#allocation8], %s1574_s30, %s1574_s30, %s1575_s12  }
  0x3e   : > { %s1441_s14 = scalar_lea.hbm %s1947_s5, 1024 }
  0x3f   : > { %p1442_p11 = scmp.ne.s32.totalorder %s1947_s5, %s1441_s14  ;;  %p1448_p0 = scmp.lt.u32.totalorder %s1441_s14, %s1947_s5 }
  0x41   : > { %p1444_p12 = pnand %p1442_p11, %p1692_p7 }
  0x43   : > { %p1445_p13 = pneg %p1444_p12 }
  0x45   : > { %p1450_p2 = pnand %p1448_p0, %p1445_p13 }
  0x47   : > { %1453 = shalt.err (!%p1450_p2)
}
  0x48   : > { %s1454_s26 = scalar_lea.vmem %s1682_s29, 1024  ;;  %p1462_p9 = scmp.lt.s32.totalorder %s1682_s29, %s1682_s29 }
  0x49   : > { %p1455_p4 = scmp.ne.s32.totalorder %s1682_s29, %s1454_s26  ;;  %p1463_p10 = scmp.lt.s32.totalorder %s1454_s26, %s1454_s26 }
  0x4b   : > { %p1457_p6 = pnand %p1455_p4, %p1692_p7  ;;  %p1464_p11 = por %p1463_p10, %p1462_p9 }
  0x4d   : > { %p1458_p8 = pneg %p1457_p6 }
  0x4f   : > { %p1465_p12 = pnand %p1464_p11, %p1458_p8 }
  0x51   : > { %1468 = shalt.err (!%p1465_p12)
}
  0x52   : > { %1290 = dma.hbm_to_vmem [thread:$0]  (!%p1676_p5), %s1947_s5, 1024, %s1682_s29, [#allocation5], %s1574_s30, %s1574_s30, %s1575_s12  }
  0x53   : > { %s1576_s10 = smov [#allocation9]   ;;  %s1469_s15 = scalar_lea.hbm %s1951_s9, 1024 }
  0x54   : > { %s359_s11 = sshll.u32 %s1576_s10, 4  ;;  %p1470_p13 = scmp.ne.s32.totalorder %s1951_s9, %s1469_s15  ;;  %s360_s11 = int_to_ptr.vmem [resolvable:$true] %s359_s11 }
  0x55   : > { %p1476_p4 = scmp.lt.u32.totalorder %s1469_s15, %s1951_s9 }
  0x56   : > { %p1472_p0 = pnand %p1470_p13, %p1692_p7 }
  0x58   : > { %p1473_p2 = pneg %p1472_p0 }
  0x5a   : > { %p1478_p6 = pnand %p1476_p4, %p1473_p2 }
  0x5c   : > { %1481 = shalt.err (!%p1478_p6)
}
  0x5d   : > { %s1482_s29 = scalar_lea.vmem %s360_s11, 1024  ;;  %p1490_p11 = scmp.lt.s32.totalorder %s360_s11, %s360_s11 }
  0x5e   : > { %p1483_p8 = scmp.ne.s32.totalorder %s360_s11, %s1482_s29  ;;  %p1491_p12 = scmp.lt.s32.totalorder %s1482_s29, %s1482_s29 }
  0x60   : > { %p1485_p9 = pnand %p1483_p8, %p1692_p7  ;;  %p1492_p1 = por %p1491_p12, %p1490_p11 }
  0x62   : > { %p1486_p10 = pneg %p1485_p9 }
  0x64   : > { %p1493_p3 = pnand %p1492_p1, %p1486_p10 }
  0x66   : > { %1496 = shalt.err (!%p1493_p3)
}
  0x67   : > { %1296 = dma.hbm_to_vmem [thread:$0]  (!%p1676_p5), %s1951_s9, 1024, %s360_s11, [#allocation8], %s1574_s30, %s1574_s30, %s1575_s12  }
  0x68   : > { %s1790_s27 = sadd.s32 1, %s1569_s20   ;;  %s33_s16 = sadd.s32 1, %s1565_s19 }
  0x69   : > { %s30_s10 = ssub.s32 %s1569_s20, %s1790_s27  ;;  %p40_p1 = scmp.ne.s32.totalorder %s1565_s19, %s1561_s18 }
  0x6a   : > { %p31_p3 = scmp.eq.s32.totalorder %s30_s10, 0  ;;  %p41_p7 = scmp.eq.s32.totalorder %s1569_s20, 0 }
  0x6b   : > { %p46_p13 = scmp.ne.s32.totalorder %s1561_s18, %s1557_s17  ;;  %p1305_p0 = scmp.lt.s32.totalorder %s1569_s20, 2 }
  0x6c   : > { %s1802_s13 = scalar_select %p31_p3, %s1565_s19, %s33_s16  }
  0x6d   : > { %p42_p2 = por %p41_p7, %p40_p1  ;;  %p1962_p4 = scmp.eq.s32.totalorder %s1661_s23, 0 }
  0x6e   : > { %s376_s15 = sand.u32 1, %s1565_s19   ;;  %s1093_s30 = sshll.u32 %s1569_s20, 7 }
  0x6f   : > { %p1806_p6 = por %p1962_p4, %p46_p13  ;;  %s1092_s12 = sshll.u32 %s376_s15, 3 }
  0x70   : > { %s1815_s25 = scalar_lea.hbm %s1942_s0, %s1093_s30  ;;  %s380_s17 = scalar_lea.vmem [#allocation2], %s1092_s12 }
  0x71   : > { %s387_s28 = sshll.u32 %s380_s17, 4  ;;  %p1817_p5 = pnand %p1305_p0, %p42_p2  ;;  %s1821_s28 = int_to_ptr.vmem [resolvable:$true] %s387_s28 }
  0x72   : > { %s377_s20 = scalar_lea.sflag [#allocation3], %s376_s15  ;;  %s1497_s29 = scalar_lea.hbm %s1815_s25, 128 }
  0x73   : > { %p1498_p8 = scmp.ne.s32.totalorder %s1815_s25, %s1497_s29  ;;  %p1499_p9 = pneg %p1817_p5 }
  0x74   : > { %s1502_s16 = scalar_lea.hbm %s1942_s0, 256  ;;  %p1503_p12 = scmp.lt.u32.totalorder %s1815_s25, %s1942_s0 }
  0x75   : > { %p1500_p10 = pnand %p1499_p9, %p1498_p8  ;;  %p1504_p1 = scmp.lt.u32.totalorder %s1502_s16, %s1497_s29 }
  0x76   : > { %p1506_p7 = scmp.lt.u32.totalorder %s1497_s29, %s1815_s25 }
  0x77   : > { %p1501_p11 = pneg %p1500_p10  ;;  %p1505_p3 = por %p1504_p1, %p1503_p12 }
  0x79   : > { %p1507_p13 = por %p1506_p7, %p1505_p3 }
  0x7b   : > { %p1508_p0 = pnand %p1507_p13, %p1501_p11 }
  0x7d   : > { %1511 = shalt.err (!%p1508_p0)
}
  0x7e   : > { %s1512_s15 = scalar_lea.vmem %s1821_s28, 128  ;;  %s1577_s12 = smov [#allocation2]  }
  0x7f   : > { %p1513_p2 = scmp.ne.s32.totalorder %s1821_s28, %s1512_s15  ;;  %s1517_s11 = sshll.u32 %s1577_s12, 4  ;;  %s1518_s11 = int_to_ptr.vmem [resolvable:$false] %s1517_s11 }
  0x80   : > { %s1519_s21 = scalar_lea.vmem %s1518_s11, 256  ;;  %p1520_p10 = scmp.lt.s32.totalorder %s1821_s28, %s1518_s11 }
  0x81   : > { %p1515_p4 = pnand %p1513_p2, %p1499_p9  ;;  %p1521_p12 = scmp.lt.s32.totalorder %s1519_s21, %s1512_s15 }
  0x83   : > { %p1516_p8 = pneg %p1515_p4  ;;  %p1522_p1 = por %p1521_p12, %p1520_p10 }
  0x85   : > { %p1523_p3 = pnand %p1522_p1, %p1516_p8 }
  0x87   : > { %1526 = shalt.err (!%p1523_p3)
}
  0x88   : > { %1300 = dma.hbm_to_vmem [thread:$0]  (!%p1817_p5), %s1815_s25, 128, %s1821_s28, %s377_s20  }
  0x89   : > { %p1965_p11 = scmp.ne.s32.totalorder %s1959_s24, 0 }
  0x8a   : > { %s398_s17 = sand.u32 (!%p1965_p11), 1, %s1561_s18  }
  0x8b   : > { %396 = sbr.rel (%p1965_p11) target bundleno = 1259 (0x4eb), region = 64  ;;  %s1095_s29 = sshll.u32 (!%p1965_p11), %s398_s17, 3 }
  0x8c   : > { %s399_s22 = scalar_lea.sflag (!%p1965_p11), [#allocation3], %s398_s17  ;;  %s402_s8 = scalar_lea.vmem (!%p1965_p11), [#allocation2], %s1095_s29 }
  0x92   : > { %1544 = dma.done.wait (%p1806_p6), %s399_s22, 128  }
  0x93   : > { %1546 = vsyncadd (%p1806_p6), %s399_s22, 4294967168  ;;  %p1966_p9 = scmp.eq.s32.totalorder %s1661_s23, 0 }
  0x95   : > { %1548 = dma.done.wait (%p1966_p9), [#allocation5], 2048   ;;  %p1967_p7 = pmov %p1966_p9 }
  0x97   : > { %1550 = vsyncadd (%p1967_p7), [#allocation5], 4294965248  ;;  %p1968_p5 = pmov %p1967_p7 }
  0x99   : > { %1552 = dma.done.wait (%p1968_p5), [#allocation8], 2048   ;;  %p1969_p13 = pmov %p1968_p5 }
  0x9a   : > { %v1578_v0 = vmov 0.0   ;;  %vm1579_vm0 = vmmov 0   ;;  %v1350_v1 = vld [vmem:[%s1943_s1] sm:$0xff]   ;;  %vm478_vm1 = vcmask 130048   ;;  %v1351_v4 = vld [vmem:[#allocation4] sm:$0xff]   ;;  %v1352_v5 = vld [vmem:[#allocation4 + $0x8] sm:$0xff]  }
  0x9b   : > { %1554 = vsyncadd (%p1969_p13), [#allocation8], 4294965248  ;;  %1180 = vmatprep.subr.bf16.mxu0 %v1578_v0  ;;  %1182 = vmatprep.mubr.msk.bf16.mxu0 %vm1579_vm0, %v1578_v0  ;;  %v461_v2 = vld [vmem:[%s402_s8] sm:$0xff]  ;;  %v1355_v8 = vld [vmem:[#allocation4 + $0x20] sm:$0xff]   ;;  %s1970_s12 = sld [smem:[#allocation13_spill]]  ;;  %s1971_s17 = sld [smem:[#allocation14_spill]] }
  0x9c   : > { %1186 = vmatprep.subr.bf16.mxu1 %v1578_v0  ;;  %1202 = vmatprep.mubr.msk.bf16.mxu1 %vm1579_vm0, %v1578_v0  ;;  %v462_v3 = vpack.c.bf16 %v461_v2, %v461_v2  ;;  %v1353_v6 = vld [vmem:[#allocation4 + $0x10] sm:$0xff]   ;;  %v1354_v7 = vld [vmem:[#allocation4 + $0x18] sm:$0xff]   ;;  %v1356_v9 = vld [vmem:[#allocation4 + $0x28] sm:$0xff]   ;;  %p456_p6 = scmp.lt.s32.totalorder %s1661_s23, 1  ;;  %s1972_s24 = sld [smem:[#allocation15_spill]] }
  0x9d   : > { %1181 = vmatpush3.bf16.msra.mxu0 %v1350_v1  ;;  %1187 = vmatpush3.bf16.msra.mxu1 %v1351_v4  ;;  %v1357_v10 = vld [vmem:[#allocation4 + $0x30] sm:$0xff]   ;;  %v1358_v11 = vld [vmem:[#allocation4 + $0x38] sm:$0xff]   ;;  %v1359_v12 = vld [vmem:[#allocation6] sm:$0xff]  }
  0x9e   : > { %1206 = vmatprep.subr.bf16.mxu0 %v1578_v0  ;;  %1188 = vmatprep.subr.bf16.mxu1 %v1578_v0  ;;  %v1360_v13 = vld [vmem:[#allocation6 + $0x8] sm:$0xff]   ;;  %v1361_v14 = vld [vmem:[#allocation6 + $0x10] sm:$0xff]   ;;  %v1362_v15 = vld [vmem:[#allocation6 + $0x18] sm:$0xff]   ;;  %s1978_s23 = smov (!%p456_p6, %s1661_s23), 1 }
  0x9f   : > { %v1363_v16 = vld [vmem:[#allocation6 + $0x20] sm:$0xff]   ;;  %v1364_v17 = vld [vmem:[#allocation6 + $0x28] sm:$0xff]   ;;  %v1101_v18 = vld [vmem:[%s1944_s2] ss:$0 sm:$0xff]  ;;  %s1100_s29 = sshll.u32 %s1978_s23, 3 }
  0xa0   : > { %1183 = vmatmul.mubr.msk.bf16.vlgmr.msra.gmra.mrb[0].mxu0 %vm478_vm1, %v462_v3  ;;  %v1365_v26 = vld [vmem:[#allocation6 + $0x30] sm:$0xff]   ;;  %v1366_v27 = vld [vmem:[#allocation6 + $0x38] sm:$0xff]   ;;  %v1367_v28 = vld [vmem:[#allocation7] sm:$0xff]  }
  0xa1   : > { %1222 = vmatprep.mubr.msk.bf16.mxu0 %vm1579_vm0, %v1578_v0  ;;  %1189 = vmatpush3.bf16.msra.mxu1 %v1352_v5  ;;  %v1368_v29 = vld [vmem:[#allocation7 + $0x8] sm:$0xff]   ;;  %v1369_v30 = vld [vmem:[#allocation7 + $0x10] sm:$0xff]   ;;  %v1370_v31 = vld [vmem:[#allocation7 + $0x18] sm:$0xff]  }
  0xa2   : > { %1190 = vmatprep.subr.bf16.mxu1 %v1578_v0  ;;  %1207 = vmatpush3.bf16.msra.mxu0 %v1359_v12  ;;  %v1371_v32 = vld [vmem:[#allocation7 + $0x20] sm:$0xff]   ;;  %v1372_v33 = vld [vmem:[#allocation7 + $0x28] sm:$0xff]   ;;  %v1104_v34 = vld [vmem:[%s1946_s4] ss:$0 sm:$0xff]  ;;  %s459_s14 = scalar_lea.vmem %s1972_s24, %s1100_s29 }
  0xa3   : > { %1208 = vmatprep.subr.bf16.mxu0 %v1578_v0  ;;  %v1373_v42 = vld [vmem:[#allocation7 + $0x30] sm:$0xff]   ;;  %v1374_v43 = vld [vmem:[#allocation7 + $0x38] sm:$0xff]   ;;  %v1375_v44 = vld [vmem:[#allocation9] sm:$0xff]  }
  0xa4   : > { %v1376_v45 = vld [vmem:[#allocation9 + $0x8] sm:$0xff]   ;;  %v1377_v46 = vld [vmem:[#allocation9 + $0x10] sm:$0xff]   ;;  %v1378_v47 = vld [vmem:[#allocation9 + $0x18] sm:$0xff]  }
  0xa5   : > { %1191 = vmatpush3.bf16.msra.mxu1 %v1353_v6  ;;  %v1379_v48 = vld [vmem:[#allocation9 + $0x20] sm:$0xff]   ;;  %v1380_v49 = vld [vmem:[#allocation9 + $0x28] sm:$0xff]   ;;  %v1113_v50 = vld [vmem:[%s1948_s6] ss:$0 sm:$0xff] }
  0xa6   : > { %1192 = vmatprep.subr.bf16.mxu1 %v1578_v0  ;;  %1209 = vmatpush3.bf16.msra.mxu0 %v1360_v13  ;;  %v1381_v58 = vld [vmem:[#allocation9 + $0x30] sm:$0xff]   ;;  %v1382_v59 = vld [vmem:[#allocation9 + $0x38] sm:$0xff]  }
  0xa7   : > { %1210 = vmatprep.subr.bf16.mxu0 %v1578_v0  ;;  %v1122_v60 = vld [vmem:[%s1970_s12] ss:$0 sm:$0xff] }
  0xa8   : > { %v1131_v5 = vld [vmem:[%s1971_s17] ss:$0 sm:$0xff] }
  0xa9   : > { %1193 = vmatpush3.bf16.msra.mxu1 %v1354_v7 }
  0xaa   : > { %1194 = vmatprep.subr.bf16.mxu1 %v1578_v0  ;;  %1211 = vmatpush3.bf16.msra.mxu0 %v1361_v14 }
  0xab   : > { %1212 = vmatprep.subr.bf16.mxu0 %v1578_v0 }
  0xad   : > { %1195 = vmatpush3.bf16.msra.mxu1 %v1355_v8 }
  0xae   : > { %1196 = vmatprep.subr.bf16.mxu1 %v1578_v0  ;;  %1213 = vmatpush3.bf16.msra.mxu0 %v1362_v15 }
  0xaf   : > { %1214 = vmatprep.subr.bf16.mxu0 %v1578_v0 }
  0xb1   : > { %1197 = vmatpush3.bf16.msra.mxu1 %v1356_v9  ;;  %v974_v9 = vlaneseq }
  0xb2   : > { %1198 = vmatprep.subr.bf16.mxu1 %v1578_v0  ;;  %1215 = vmatpush3.bf16.msra.mxu0 %v1363_v16 }
  0xb3   : > { %1216 = vmatprep.subr.bf16.mxu0 %v1578_v0 }
  0xb5   : > { %1199 = vmatpush3.bf16.msra.mxu1 %v1357_v10 }
  0xb6   : > { %1200 = vmatprep.subr.bf16.mxu1 %v1578_v0  ;;  %1217 = vmatpush3.bf16.msra.mxu0 %v1364_v17 }
  0xb7   : > { %1218 = vmatprep.subr.bf16.mxu0 %v1578_v0 }
  0xb9   : > { %1201 = vmatpush3.bf16.msra.mxu1 %v1358_v11  ;;  %v975_v11 = vand.u32 127, %v974_v9 }
  0xba   : > { %1226 = vmatprep.subr.bf16.mxu1 %v1578_v0  ;;  %1219 = vmatpush3.bf16.msra.mxu0 %v1365_v26 }
  0xbb   : > { %1220 = vmatprep.subr.bf16.mxu0 %v1578_v0  ;;  %vm976_vm2 = vcmp.lt.s32.totalorder %v975_v11, 4 }
  0xbe   : > { %1221 = vmatpush3.bf16.msra.mxu0 %v1366_v27 }
  0xbf   : > { %1246 = vmatprep.subr.bf16.mxu0 %v1578_v0 }
 0x173   : > { %v516_v19 = vpop.f32.mrb[0].mxu0 }
 0x174   : > { %v517_v20 = vadd.f32 %v1101_v18, %v516_v19  ;;  %v1184_v21 = vpop.f32.mrb[1].mxu0 }
 0x175   : > { %v519_v22 = vpop.f32.mrb[2].mxu0 }
 0x176   : > { %v522_v23 = vmax.f32 %v517_v20, 0.0  ;;  %v1185_v24 = vpop.f32.mrb[3].mxu0 }
 0x178   : > { %v523_v25 = vpack.c.bf16 %v522_v23, %v522_v23 }
 0x17a   : > { %1203 = vmatmul.mubr.bf16.vlgmr.msra.gmra.mrb[0].mxu1 %v523_v25 }
 0x17b   : > { %1242 = vmatprep.mubr.msk.bf16.mxu1 %vm1579_vm0, %v1578_v0  ;;  %1227 = vmatpush3.bf16.msra.mxu1 %v1367_v28 }
 0x17c   : > { %1228 = vmatprep.subr.bf16.mxu1 %v1578_v0 }
 0x17f   : > { %1229 = vmatpush3.bf16.msra.mxu1 %v1368_v29 }
 0x180   : > { %1230 = vmatprep.subr.bf16.mxu1 %v1578_v0 }
 0x183   : > { %1231 = vmatpush3.bf16.msra.mxu1 %v1369_v30 }
 0x184   : > { %1232 = vmatprep.subr.bf16.mxu1 %v1578_v0 }
 0x187   : > { %1233 = vmatpush3.bf16.msra.mxu1 %v1370_v31 }
 0x188   : > { %1234 = vmatprep.subr.bf16.mxu1 %v1578_v0 }
 0x18b   : > { %1235 = vmatpush3.bf16.msra.mxu1 %v1371_v32 }
 0x18c   : > { %1236 = vmatprep.subr.bf16.mxu1 %v1578_v0 }
 0x18f   : > { %1237 = vmatpush3.bf16.msra.mxu1 %v1372_v33 }
 0x190   : > { %1238 = vmatprep.subr.bf16.mxu1 %v1578_v0 }
 0x193   : > { %1239 = vmatpush3.bf16.msra.mxu1 %v1373_v42 }
 0x194   : > { %1240 = vmatprep.subr.bf16.mxu1 %v1578_v0 }
 0x197   : > { %1241 = vmatpush3.bf16.msra.mxu1 %v1374_v43 }
 0x24d   : > { %v629_v35 = vpop.f32.mrb[0].mxu1 }
 0x24e   : > { %v630_v36 = vadd.f32 %v1104_v34, %v629_v35  ;;  %v1204_v37 = vpop.f32.mrb[1].mxu1 }
 0x24f   : > { %v632_v38 = vpop.f32.mrb[2].mxu1 }
 0x250   : > { %v635_v39 = vmax.f32 %v630_v36, 0.0  ;;  %v1205_v40 = vpop.f32.mrb[3].mxu1 }
 0x252   : > { %v636_v41 = vpack.c.bf16 %v635_v39, %v635_v39 }
 0x254   : > { %1223 = vmatmul.mubr.bf16.vlgmr.msra.gmra.mrb[4].mxu0 %v636_v41 }
 0x255   : > { %1262 = vmatprep.mubr.msk.bf16.mxu0 %vm1579_vm0, %v1578_v0  ;;  %1247 = vmatpush3.bf16.msra.mxu0 %v1375_v44 }
 0x256   : > { %1248 = vmatprep.subr.bf16.mxu0 %v1578_v0 }
 0x259   : > { %1249 = vmatpush3.bf16.msra.mxu0 %v1376_v45 }
 0x25a   : > { %1250 = vmatprep.subr.bf16.mxu0 %v1578_v0 }
 0x25d   : > { %1251 = vmatpush3.bf16.msra.mxu0 %v1377_v46 }
 0x25e   : > { %1252 = vmatprep.subr.bf16.mxu0 %v1578_v0 }
 0x261   : > { %1253 = vmatpush3.bf16.msra.mxu0 %v1378_v47 }
 0x262   : > { %1254 = vmatprep.subr.bf16.mxu0 %v1578_v0 }
 0x265   : > { %1255 = vmatpush3.bf16.msra.mxu0 %v1379_v48 }
 0x266   : > { %1256 = vmatprep.subr.bf16.mxu0 %v1578_v0 }
 0x269   : > { %1257 = vmatpush3.bf16.msra.mxu0 %v1380_v49 }
 0x26a   : > { %1258 = vmatprep.subr.bf16.mxu0 %v1578_v0 }
 0x26d   : > { %1259 = vmatpush3.bf16.msra.mxu0 %v1381_v58 }
 0x26e   : > { %1260 = vmatprep.subr.bf16.mxu0 %v1578_v0 }
 0x271   : > { %1261 = vmatpush3.bf16.msra.mxu0 %v1382_v59 }
 0x327   : > { %v742_v51 = vpop.f32.mrb[4].mxu0 }
 0x328   : > { %v743_v52 = vadd.f32 %v1113_v50, %v742_v51  ;;  %v1224_v53 = vpop.f32.mrb[5].mxu0 }
 0x329   : > { %v745_v54 = vpop.f32.mrb[6].mxu0 }
 0x32a   : > { %v748_v55 = vmax.f32 %v743_v52, 0.0  ;;  %v1225_v56 = vpop.f32.mrb[7].mxu0 }
 0x32c   : > { %v749_v57 = vpack.c.bf16 %v748_v55, %v748_v55 }
 0x32e   : > { %1243 = vmatmul.mubr.bf16.vlgmr.msra.gmra.mrb[4].mxu1 %v749_v57 }
 0x401   : > { %v855_v61 = vpop.f32.mrb[4].mxu1 }
 0x402   : > { %v856_v62 = vadd.f32 %v1122_v60, %v855_v61  ;;  %v1244_v63 = vpop.f32.mrb[5].mxu1 }
 0x403   : > { %v858_v1 = vpop.f32.mrb[6].mxu1 }
 0x404   : > { %v861_v2 = vmax.f32 %v856_v62, 0.0  ;;  %v1245_v3 = vpop.f32.mrb[7].mxu1 }
 0x406   : > { %v862_v4 = vpack.c.bf16 %v861_v2, %v861_v2 }
 0x408   : > { %1263 = vmatmul.mubr.bf16.vlgmr.msra.gmra.mrb[8].mxu0 %v862_v4 }
 0x4db   : > { %v968_v0 = vpop.f32.mrb[8].mxu0 }
 0x4dc   : > { %v969_v6 = vadd.f32 %v1131_v5, %v968_v0  ;;  %v1264_v7 = vpop.f32.mrb[9].mxu0 }
 0x4dd   : > { %v971_v8 = vpop.f32.mrb[10].mxu0 }
 0x4de   : > { %1383 = vtanh.f32 %v969_v6  ;;  %v1265_v10 = vpop.f32.mrb[11].mxu0  ;;  %v978_v12 = vmax.f32 %v969_v6, -20.0 }
 0x4e0   : > { %v979_v13 = vmin.f32 %v978_v12, 2.0 }
 0x4e8   : > { %v1384_v14 = vpop.eup %1383 }
 0x4e9   : > { %v980_v15 = vsel %vm976_vm2, %v1384_v14, %v979_v13 }
 0x4ea   : > { %981 = vst [vmem:[%s459_s14] sm:$0xff] %v980_v15 }
 0x4eb PF: > { %p23_p0 = scmp.ge.s32.totalorder %s1790_s27, 4   ;;  %s1973_s17 = smov %s1561_s18 }
 0x4ec   : > { %s1974_s18 = smov %s1565_s19  ;;  %s1975_s19 = smov %s1802_s13 }
 0x4ed   : > { %s1976_s20 = smov %s1790_s27  ;;  %25 = sbr.rel (!%p23_p0) target bundleno = 9 (0x9), region = 120 }
 0x4f4   :  { %1001 = vsyncpa [#allocation3], 1 }
 0x4f5   :  { %1003 = vsyncpa [#allocation3 + $0x1], 1 }
 0x4f6   :  { %1004 = vsyncpa [#allocation5], 1 }
 0x4f7   :  { %1005 = vsyncpa [#allocation8], 1 }

</bundles_post_ra>
